<compile_context>
chip_gen: v7x
topology: tpu7x:2x2x1
jax: 0.10.0
libtpu: 0.0.40
codegen_flags: <defaults>
</compile_context>

<pallas_src>
import math

import jax
import jax.numpy as jnp
from jax import lax
from jax.experimental import pallas as pl
from jax.experimental.pallas import tpu as pltpu

M, N, D = 128, 256, 64  # query rows, key/value rows, head dim


def attention_kernel(q_ref, k_ref, v_ref, o_ref):
    # Single-shot fused attention: QK^T (MXU) -> softmax (VPU/EUP) -> PV (MXU).
    scale = 1.0 / math.sqrt(D)
    q = q_ref[...] * scale        # (M, D)  fold scale into the small operand
    k = k_ref[...]                # (N, D)
    v = v_ref[...]                # (N, D)

    # Contract last dim of both q and k -> (M, N); no explicit k.T formed.
    s = lax.dot_general(
        q, k,
        dimension_numbers=(((1,), (1,)), ((), ())),
        preferred_element_type=jnp.float32,
    )

    m = jnp.max(s, axis=-1, keepdims=True)        # (M, 1)
    p = jnp.exp(s - m)                            # (M, N) unnormalized probs
    l = jnp.sum(p, axis=-1, keepdims=True)        # (M, 1)

    # dropout_p == 0 -> identity (no-op)
    o = jnp.dot(p, v, preferred_element_type=jnp.float32)   # (M, D)

    # Deferred normalization on the small (M, D) output; EUP approx reciprocal.
    o_ref[...] = (o * pl.reciprocal(l, approx=True)).astype(o_ref.dtype)


def attention_forward(query, key, value):
    out = pl.pallas_call(
        attention_kernel,
        out_shape=jax.ShapeDtypeStruct((M, D), jnp.float32),
        in_specs=[
            pl.BlockSpec(memory_space=pltpu.MemorySpace.VMEM),
            pl.BlockSpec(memory_space=pltpu.MemorySpace.VMEM),
            pl.BlockSpec(memory_space=pltpu.MemorySpace.VMEM),
        ],
        out_specs=pl.BlockSpec(memory_space=pltpu.MemorySpace.VMEM),
    )(query, key, value)
    return out[None, :, :]  # (1, M, D) to match torch's unsqueeze(0)


def model_forward(input1, query, key, value):
    # input1 is unused by the reference module's forward.
    del input1
    return attention_forward(query, key, value)


def reference_forward(query, key, value):
    q = query[None]                                      # (1, M, D)
    qk = jnp.matmul(q, jnp.swapaxes(key, -2, -1))        # (1, M, N)
    scaled = qk / math.sqrt(value.shape[-1])
    p = jax.nn.softmax(scaled, axis=-1)
    return jnp.matmul(p, value)                          # (1, M, D)


if __name__ == "__main__":
    root = jax.random.PRNGKey(0)
    k_q, k_k, k_v, k_in = jax.random.split(root, 4)

    # torch.rand -> uniform [0, 1)
    query = jax.random.uniform(k_q, (M, D), dtype=jnp.float32)
    key = jax.random.uniform(k_k, (N, D), dtype=jnp.float32)
    value = jax.random.uniform(k_v, (N, D), dtype=jnp.float32)

    # Dummy unused input (forward never reads it) — small shape.
    input1 = jax.random.normal(k_in, (2, 4, 16, 16), dtype=jnp.float32)

    out = model_forward(input1, query, key, value)
    out = jax.block_until_ready(out)

    ref = reference_forward(query, key, value)
    assert out.shape == (1, M, D), out.shape
    # Tolerance accounts for the EUP approx reciprocal (~2^-12 relative).
    assert jnp.allclose(out, ref, atol=2e-4, rtol=2e-4), (
        float(jnp.max(jnp.abs(out - ref)))
    )

    print("KERNEL_OK")
</pallas_src>

<mosaic_0001>
module attributes {stable_mosaic.version = 11 : i64} {
  func.func @attention_kernel(%arg0: memref<128x64xf32, #tpu.memory_space<vmem>>, %arg1: memref<256x64xf32, #tpu.memory_space<vmem>>, %arg2: memref<256x64xf32, #tpu.memory_space<vmem>>, %arg3: memref<128x64xf32, #tpu.memory_space<vmem>>) attributes {dimension_semantics = [], scalar_prefetch = 0 : i64, scratch_operands = 0 : i64, tpu.core_type = #tpu.core_type<tc>} {
    %c0 = arith.constant 0 : index
    %c0_0 = arith.constant 0 : index
    %0 = vector.load %arg0[%c0, %c0_0] : memref<128x64xf32, #tpu.memory_space<vmem>>, vector<128x64xf32>
    %cst = arith.constant 1.250000e-01 : f32
    %1 = vector.broadcast %cst : f32 to vector<128x64xf32>
    %2 = arith.mulf %0, %1 : vector<128x64xf32>
    %c0_1 = arith.constant 0 : index
    %c0_2 = arith.constant 0 : index
    %3 = vector.load %arg1[%c0_1, %c0_2] : memref<256x64xf32, #tpu.memory_space<vmem>>, vector<256x64xf32>
    %c0_3 = arith.constant 0 : index
    %c0_4 = arith.constant 0 : index
    %4 = vector.load %arg2[%c0_3, %c0_4] : memref<256x64xf32, #tpu.memory_space<vmem>>, vector<256x64xf32>
    %cst_5 = arith.constant dense<0.000000e+00> : vector<128x256xf32>
    %5 = tpu.matmul %2, %3, %cst_5 {dimension_numbers = #tpu.dot_dimension_numbers<[1], [1], [0], [0], [0, 0, 1, 0], [], []>} : vector<128x64xf32>, vector<256x64xf32>, vector<128x256xf32> -> vector<128x256xf32>
    %cst_6 = arith.constant dense<0xFF800000> : vector<128xf32>
    %6 = vector.multi_reduction <maximumf>, %5, %cst_6 [1] : vector<128x256xf32> to vector<128xf32>
    %7 = vector.shape_cast %6 : vector<128xf32> to vector<128x1xf32>
    %8 = vector.broadcast %7 : vector<128x1xf32> to vector<128x256xf32>
    %9 = arith.subf %5, %8 : vector<128x256xf32>
    %10 = math.exp %9 : vector<128x256xf32>
    %cst_7 = arith.constant dense<0.000000e+00> : vector<128xf32>
    %11 = vector.multi_reduction <add>, %10, %cst_7 [1] : vector<128x256xf32> to vector<128xf32>
    %12 = vector.shape_cast %11 : vector<128xf32> to vector<128x1xf32>
    %cst_8 = arith.constant dense<0.000000e+00> : vector<128x64xf32>
    %13 = tpu.matmul %10, %4, %cst_8 {dimension_numbers = #tpu.dot_dimension_numbers<[1], [0], [0], [1], [0, 0, 1, 1], [], []>} : vector<128x256xf32>, vector<256x64xf32>, vector<128x64xf32> -> vector<128x64xf32>
    %14 = tpu.reciprocal %12 {approx = true} : vector<128x1xf32> -> vector<128x1xf32>
    %15 = vector.broadcast %14 : vector<128x1xf32> to vector<128x64xf32>
    %16 = arith.mulf %13, %15 : vector<128x64xf32>
    %c0_9 = arith.constant 0 : index
    %c0_10 = arith.constant 0 : index
    %17 = vector.load %arg3[%c0_9, %c0_10] : memref<128x64xf32, #tpu.memory_space<vmem>>, vector<128x64xf32>
    tpu.vector_store %arg3[%c0_9, %c0_10], %16 {strides = array<i32>} : memref<128x64xf32, #tpu.memory_space<vmem>>, vector<128x64xf32>,
    return
  }
}

</mosaic_0001>

<bundles_post_ra>
// kernel: tpu_custom_call.1
= control target key start
LH: loop header
LB: loop body
LE: loop exit
PB: predicated region body
PF: predicated region fallthrough
CT: control target
= control target key end

     0   :  { %vm110_vm0 = vcmask 523264   ;;  %s1695_s1 = inlined_call_operand.vmem [shape: f32[256,64], index: 1, kind: input, shape index: {}]   ;;  %s1696_s0 = inlined_call_operand.vmem [shape: f32[128,64], index: 0, kind: input, shape index: {}]   ;;  %s1697_s2 = inlined_call_operand.vmem [shape: f32[256,64], index: 2, kind: input, shape index: {}]   ;;  %s1698_s3 = inlined_call_operand.vmem [shape: f32[128,64], index: 3, kind: output, shape index: {}]  }
   0x1   :  { %v62_v0 = vld [vmem:[%s1695_s1 + $0x80] sm:$0xff]  ;;  %v63_v1 = vld [vmem:[%s1695_s1 + $0x88] sm:$0xff]  ;;  %vm1201_vm1 = vmpackc.low %vm110_vm0, %vm110_vm0 }
   0x2   :  { %v997_v3 = vpack.c.bf16 %v63_v1, %v62_v0  ;;  %v46_v4 = vld [vmem:[%s1695_s1] sm:$0xff]  ;;  %v47_v5 = vld [vmem:[%s1695_s1 + $0x8] sm:$0xff]  ;;  %v64_v6 = vld [vmem:[%s1695_s1 + $0x90] sm:$0xff] }
   0x3   :  { %v1000_v7 = vpack.c.bf16 %v47_v5, %v46_v4  ;;  %v65_v8 = vld [vmem:[%s1695_s1 + $0x98] sm:$0xff]  ;;  %v48_v10 = vld [vmem:[%s1695_s1 + $0x10] sm:$0xff]  ;;  %v66_v12 = vld [vmem:[%s1695_s1 + $0xa0] sm:$0xff] }
   0x4   :  { %999 = vmatprep.subr.msk.bf16.mxu0 %vm1201_vm1, %v997_v3  ;;  %v1003_v9 = vpack.c.bf16 %v65_v8, %v64_v6  ;;  %v49_v11 = vld [vmem:[%s1695_s1 + $0x18] sm:$0xff]  ;;  %v67_v13 = vld [vmem:[%s1695_s1 + $0xa8] sm:$0xff]  ;;  %v14_v16 = vld [vmem:[%s1696_s0] sm:$0xff] }
   0x5   :  { %1002 = vmatpush3.bf16.xpose.msk.msra.mxu0 %vm1201_vm1, %v1000_v7  ;;  %v1006_v14 = vpack.c.bf16 %v49_v11, %v48_v10  ;;  %v1009_v15 = vpack.c.bf16 %v67_v13, %v66_v12  ;;  %v30_v17 = vmul.f32 0.125, %v14_v16  ;;  %v50_v18 = vld [vmem:[%s1695_s1 + $0x20] sm:$0xff]  ;;  %v51_v19 = vld [vmem:[%s1695_s1 + $0x28] sm:$0xff]  ;;  %v68_v20 = vld [vmem:[%s1695_s1 + $0xb0] sm:$0xff] }
   0x6   :  { %1005 = vmatprep.subr.msk.bf16.mxu0 %vm1201_vm1, %v1003_v9  ;;  %v69_v21 = vld [vmem:[%s1695_s1 + $0xb8] sm:$0xff]  ;;  %v1012_v22 = vpack.c.bf16 %v51_v19, %v50_v18  ;;  %v52_v24 = vld [vmem:[%s1695_s1 + $0x30] sm:$0xff]  ;;  %v70_v26 = vld [vmem:[%s1695_s1 + $0xc0] sm:$0xff] }
   0x7   :  { %885 = vmatprep.mubr.msk.f32.mxu0 %vm110_vm0, %v30_v17  ;;  %v1015_v23 = vpack.c.bf16 %v69_v21, %v68_v20  ;;  %v53_v25 = vld [vmem:[%s1695_s1 + $0x38] sm:$0xff]  ;;  %v71_v27 = vld [vmem:[%s1695_s1 + $0xc8] sm:$0xff]  ;;  %v54_v30 = vld [vmem:[%s1695_s1 + $0x40] sm:$0xff] }
   0x8   :  { %v1018_v28 = vpack.c.bf16 %v53_v25, %v52_v24  ;;  %v1021_v29 = vpack.c.bf16 %v71_v27, %v70_v26  ;;  %v55_v31 = vld [vmem:[%s1695_s1 + $0x48] sm:$0xff]  ;;  %v72_v32 = vld [vmem:[%s1695_s1 + $0xd0] sm:$0xff]  ;;  %v73_v33 = vld [vmem:[%s1695_s1 + $0xd8] sm:$0xff] }
   0x9   :  { %v1024_v34 = vpack.c.bf16 %v55_v31, %v54_v30  ;;  %v1027_v35 = vpack.c.bf16 %v73_v33, %v72_v32  ;;  %v56_v36 = vld [vmem:[%s1695_s1 + $0x50] sm:$0xff]  ;;  %v57_v37 = vld [vmem:[%s1695_s1 + $0x58] sm:$0xff]  ;;  %v74_v38 = vld [vmem:[%s1695_s1 + $0xe0] sm:$0xff] }
   0xa   :  { %v75_v39 = vld [vmem:[%s1695_s1 + $0xe8] sm:$0xff]  ;;  %v1030_v40 = vpack.c.bf16 %v57_v37, %v56_v36  ;;  %v58_v42 = vld [vmem:[%s1695_s1 + $0x60] sm:$0xff]  ;;  %v76_v44 = vld [vmem:[%s1695_s1 + $0xf0] sm:$0xff] }
   0xb   :  { %v1033_v41 = vpack.c.bf16 %v75_v39, %v74_v38  ;;  %v59_v43 = vld [vmem:[%s1695_s1 + $0x68] sm:$0xff]  ;;  %v77_v45 = vld [vmem:[%s1695_s1 + $0xf8] sm:$0xff]  ;;  %v60_v48 = vld [vmem:[%s1695_s1 + $0x70] sm:$0xff] }
   0xc   :  { %v1036_v46 = vpack.c.bf16 %v59_v43, %v58_v42  ;;  %v1039_v47 = vpack.c.bf16 %v77_v45, %v76_v44  ;;  %v61_v49 = vld [vmem:[%s1695_s1 + $0x78] sm:$0xff]  ;;  %v15_v51 = vld [vmem:[%s1696_s0 + $0x8] sm:$0xff]  ;;  %v16_v53 = vld [vmem:[%s1696_s0 + $0x10] sm:$0xff] }
   0xd   :  { %1008 = vmatpush3.bf16.xpose.msk.msra.mxu0 %vm1201_vm1, %v1006_v14  ;;  %v1042_v50 = vpack.c.bf16 %v61_v49, %v60_v48  ;;  %v31_v52 = vmul.f32 0.125, %v15_v51  ;;  %v32_v54 = vmul.f32 0.125, %v16_v53  ;;  %v17_v55 = vld [vmem:[%s1696_s0 + $0x18] sm:$0xff]  ;;  %v18_v57 = vld [vmem:[%s1696_s0 + $0x20] sm:$0xff]  ;;  %v19_v59 = vld [vmem:[%s1696_s0 + $0x28] sm:$0xff] }
   0xe   :  { %1011 = vmatprep.subr.msk.bf16.mxu0 %vm1201_vm1, %v1009_v15  ;;  %v33_v56 = vmul.f32 0.125, %v17_v55  ;;  %v34_v58 = vmul.f32 0.125, %v18_v57  ;;  %v35_v60 = vmul.f32 0.125, %v19_v59  ;;  %v20_v61 = vld [vmem:[%s1696_s0 + $0x30] sm:$0xff]  ;;  %v21_v63 = vld [vmem:[%s1696_s0 + $0x38] sm:$0xff]  ;;  %v22_v1 = vld [vmem:[%s1696_s0 + $0x40] sm:$0xff] }
   0xf   :  { %v36_v62 = vmul.f32 0.125, %v20_v61  ;;  %v37_v0 = vmul.f32 0.125, %v21_v63  ;;  %v38_v2 = vmul.f32 0.125, %v22_v1  ;;  %v23_v3 = vld [vmem:[%s1696_s0 + $0x48] sm:$0xff]  ;;  %v24_v5 = vld [vmem:[%s1696_s0 + $0x50] sm:$0xff]  ;;  %v25_v7 = vld [vmem:[%s1696_s0 + $0x58] sm:$0xff] }
  0x10   :  { %v39_v4 = vmul.f32 0.125, %v23_v3  ;;  %v40_v6 = vmul.f32 0.125, %v24_v5  ;;  %v41_v8 = vmul.f32 0.125, %v25_v7  ;;  %v26_v9 = vld [vmem:[%s1696_s0 + $0x60] sm:$0xff]  ;;  %v27_v11 = vld [vmem:[%s1696_s0 + $0x68] sm:$0xff]  ;;  %v28_v13 = vld [vmem:[%s1696_s0 + $0x70] sm:$0xff] }
  0x11   :  { %v42_v10 = vmul.f32 0.125, %v26_v9  ;;  %v43_v12 = vmul.f32 0.125, %v27_v11  ;;  %v44_v14 = vmul.f32 0.125, %v28_v13  ;;  %v29_v15 = vld [vmem:[%s1696_s0 + $0x78] sm:$0xff]  ;;  %v95_v18 = vld [vmem:[%s1697_s2 + $0x88] sm:$0xff]  ;;  %v78_v19 = vld [vmem:[%s1697_s2] sm:$0xff] }
  0x12   :  { %v45_v16 = vmul.f32 0.125, %v29_v15  ;;  %v79_v21 = vld [vmem:[%s1697_s2 + $0x8] sm:$0xff]  ;;  %v80_v26 = vld [vmem:[%s1697_s2 + $0x10] sm:$0xff]  ;;  %v81_v27 = vld [vmem:[%s1697_s2 + $0x18] sm:$0xff] }
  0x13   :  { %v1047_v24 = vpack.c.bf16 %v79_v21, %v78_v19  ;;  %v1051_v30 = vpack.c.bf16 %v81_v27, %v80_v26  ;;  %v82_v32 = vld [vmem:[%s1697_s2 + $0x20] sm:$0xff]  ;;  %v83_v33 = vld [vmem:[%s1697_s2 + $0x28] sm:$0xff]  ;;  %v84_v38 = vld [vmem:[%s1697_s2 + $0x30] sm:$0xff] }
  0x14   :  { %v1055_v36 = vpack.c.bf16 %v83_v33, %v82_v32  ;;  %v85_v39 = vld [vmem:[%s1697_s2 + $0x38] sm:$0xff]  ;;  %v103_v55 = vld [vmem:[%s1697_s2 + $0xc8] sm:$0xff]  ;;  %v104_v63 = vld [vmem:[%s1697_s2 + $0xd0] sm:$0xff] }
  0x15   :  { %1014 = vmatpush3.bf16.xpose.msk.msra.mxu0 %vm1201_vm1, %v1012_v22  ;;  %v96_v22 = vld [vmem:[%s1697_s2 + $0x90] sm:$0xff]  ;;  %v87_v59 = vld [vmem:[%s1697_s2 + $0x48] sm:$0xff] }
  0x16   :  { %1017 = vmatprep.subr.msk.bf16.mxu0 %vm1201_vm1, %v1015_v23  ;;  %v97_v23 = vld [vmem:[%s1697_s2 + $0x98] sm:$0xff]  ;;  %v88_v3 = vld [vmem:[%s1697_s2 + $0x50] sm:$0xff]  ;;  %v107_v9 = vld [vmem:[%s1697_s2 + $0xe8] sm:$0xff] }
  0x17   :  { %v1049_v25 = vpack.c.bf16 %v97_v23, %v96_v22  ;;  %v91_v13 = vld [vmem:[%s1697_s2 + $0x68] sm:$0xff]  ;;  %v92_v21 = vld [vmem:[%s1697_s2 + $0x70] sm:$0xff]  ;;  %v93_v22 = vld [vmem:[%s1697_s2 + $0x78] sm:$0xff] }
  0x1d   :  { %1020 = vmatpush3.bf16.xpose.msk.msra.mxu0 %vm1201_vm1, %v1018_v28  ;;  %v98_v28 = vld [vmem:[%s1697_s2 + $0xa0] sm:$0xff] }
  0x1e   :  { %1023 = vmatprep.subr.msk.bf16.mxu0 %vm1201_vm1, %v1021_v29  ;;  %v99_v29 = vld [vmem:[%s1697_s2 + $0xa8] sm:$0xff] }
  0x1f   :  { %v1053_v31 = vpack.c.bf16 %v99_v29, %v98_v28 }
  0x25   :  { %1026 = vmatpush3.bf16.xpose.msk.msra.mxu0 %vm1201_vm1, %v1024_v34  ;;  %v100_v34 = vld [vmem:[%s1697_s2 + $0xb0] sm:$0xff] }
  0x26   :  { %1029 = vmatprep.subr.msk.bf16.mxu0 %vm1201_vm1, %v1027_v35  ;;  %v101_v35 = vld [vmem:[%s1697_s2 + $0xb8] sm:$0xff] }
  0x27   :  { %v1057_v37 = vpack.c.bf16 %v101_v35, %v100_v34 }
  0x2d   :  { %1032 = vmatpush3.bf16.xpose.msk.msra.mxu0 %vm1201_vm1, %v1030_v40  ;;  %v1059_v40 = vpack.c.bf16 %v85_v39, %v84_v38 }
  0x2e   :  { %1035 = vmatprep.subr.msk.bf16.mxu0 %vm1201_vm1, %v1033_v41 }
  0x35   :  { %1038 = vmatpush3.bf16.xpose.msk.msra.mxu0 %vm1201_vm1, %v1036_v46 }
  0x36   :  { %1041 = vmatprep.subr.msk.bf16.mxu0 %vm1201_vm1, %v1039_v47 }
  0x3d   :  { %1044 = vmatpush3.bf16.xpose.msk.msra.mxu0 %vm1201_vm1, %v1042_v50 }
  0x44   :  { %886 = vmatmul.mubr.msk.f32.vlgmr.msra.gmra.mrb[0].mxu0 %vm110_vm0, %v30_v17  ;;  %v94_v17 = vld [vmem:[%s1697_s2 + $0x80] sm:$0xff] }
  0x45   :  { %887 = vmatprep.mubr.msk.f32.mxu0 %vm110_vm0, %v31_v52  ;;  %v1045_v20 = vpack.c.bf16 %v95_v18, %v94_v17  ;;  %v108_v17 = vld [vmem:[%s1697_s2 + $0xf0] sm:$0xff]  ;;  %v109_v18 = vld [vmem:[%s1697_s2 + $0xf8] sm:$0xff] }
  0x47   :  { %1046 = vmatprep.subr.bf16.mxu1 %v1045_v20  ;;  %v1073_v20 = vpack.c.bf16 %v109_v18, %v108_v17 }
  0x48   :  { %888 = vmatmul.mubr.msk.f32.gmra.mrb[2].mxu0 %vm110_vm0, %v31_v52  ;;  %1048 = vmatpush3.bf16.msra.mxu1 %v1047_v24  ;;  %v1075_v24 = vpack.c.bf16 %v93_v22, %v92_v21 }
  0x49   :  { %889 = vmatprep.mubr.msk.f32.mxu0 %vm110_vm0, %v32_v54  ;;  %1050 = vmatprep.subr.bf16.mxu1 %v1049_v25 }
  0x4c   :  { %890 = vmatmul.mubr.msk.f32.gmra.mrb[4].mxu0 %vm110_vm0, %v32_v54  ;;  %1052 = vmatpush3.bf16.msra.mxu1 %v1051_v30  ;;  %v102_v54 = vld [vmem:[%s1697_s2 + $0xc0] sm:$0xff] }
  0x4d   :  { %891 = vmatprep.mubr.msk.f32.mxu0 %vm110_vm0, %v33_v56  ;;  %1054 = vmatprep.subr.bf16.mxu1 %v1053_v31  ;;  %v1061_v57 = vpack.c.bf16 %v103_v55, %v102_v54 }
  0x50   :  { %892 = vmatmul.mubr.msk.f32.gmra.mrb[6].mxu0 %vm110_vm0, %v33_v56  ;;  %1056 = vmatpush3.bf16.msra.mxu1 %v1055_v36 }
  0x51   :  { %893 = vmatprep.mubr.msk.f32.mxu0 %vm110_vm0, %v34_v58  ;;  %1058 = vmatprep.subr.bf16.mxu1 %v1057_v37 }
  0x54   :  { %894 = vmatmul.mubr.msk.f32.gmra.mrb[8].mxu0 %vm110_vm0, %v34_v58  ;;  %1060 = vmatpush3.bf16.msra.mxu1 %v1059_v40  ;;  %v86_v58 = vld [vmem:[%s1697_s2 + $0x40] sm:$0xff] }
  0x55   :  { %895 = vmatprep.mubr.msk.f32.mxu0 %vm110_vm0, %v35_v60  ;;  %v1063_v61 = vpack.c.bf16 %v87_v59, %v86_v58  ;;  %1062 = vmatprep.subr.bf16.mxu1 %v1061_v57 }
  0x58   :  { %896 = vmatmul.mubr.msk.f32.gmra.mrb[10].mxu0 %vm110_vm0, %v35_v60  ;;  %1064 = vmatpush3.bf16.msra.mxu1 %v1063_v61 }
  0x59   :  { %897 = vmatprep.mubr.msk.f32.mxu0 %vm110_vm0, %v36_v62 }
  0x5c   :  { %898 = vmatmul.mubr.msk.f32.gmra.mrb[12].mxu0 %vm110_vm0, %v36_v62 }
  0x5d   :  { %899 = vmatprep.mubr.msk.f32.mxu0 %vm110_vm0, %v37_v0 }
  0x60   :  { %900 = vmatmul.mubr.msk.f32.gmra.mrb[14].mxu0 %vm110_vm0, %v37_v0  ;;  %v105_v0 = vld [vmem:[%s1697_s2 + $0xd8] sm:$0xff] }
  0x61   :  { %901 = vmatprep.mubr.msk.f32.mxu0 %vm110_vm0, %v38_v2 }
  0x64   :  { %902 = vmatmul.mubr.msk.f32.gmra.mrb[16].mxu0 %vm110_vm0, %v38_v2  ;;  %v1065_v2 = vpack.c.bf16 %v105_v0, %v104_v63 }
  0x65   :  { %903 = vmatprep.mubr.msk.f32.mxu0 %vm110_vm0, %v39_v4 }
  0x66   :  { %1066 = vmatprep.subr.bf16.mxu1 %v1065_v2 }
  0x68   :  { %904 = vmatmul.mubr.msk.f32.gmra.mrb[18].mxu0 %vm110_vm0, %v39_v4  ;;  %v89_v4 = vld [vmem:[%s1697_s2 + $0x58] sm:$0xff] }
  0x69   :  { %905 = vmatprep.mubr.msk.f32.mxu0 %vm110_vm0, %v40_v6 }
  0x6c   :  { %906 = vmatmul.mubr.msk.f32.gmra.mrb[20].mxu0 %vm110_vm0, %v40_v6  ;;  %v1067_v6 = vpack.c.bf16 %v89_v4, %v88_v3 }
  0x6d   :  { %907 = vmatprep.mubr.msk.f32.mxu0 %vm110_vm0, %v41_v8 }
  0x6e   :  { %1068 = vmatpush3.bf16.msra.mxu1 %v1067_v6 }
  0x70   :  { %908 = vmatmul.mubr.msk.f32.gmra.mrb[22].mxu0 %vm110_vm0, %v41_v8  ;;  %v106_v8 = vld [vmem:[%s1697_s2 + $0xe0] sm:$0xff] }
  0x71   :  { %909 = vmatprep.mubr.msk.f32.mxu0 %vm110_vm0, %v42_v10  ;;  %v1069_v11 = vpack.c.bf16 %v107_v9, %v106_v8 }
  0x73   :  { %1070 = vmatprep.subr.bf16.mxu1 %v1069_v11 }
  0x74   :  { %910 = vmatmul.mubr.msk.f32.gmra.mrb[24].mxu0 %vm110_vm0, %v42_v10 }
  0x75   :  { %911 = vmatprep.mubr.msk.f32.mxu0 %vm110_vm0, %v43_v12 }
  0x78   :  { %912 = vmatmul.mubr.msk.f32.gmra.mrb[26].mxu0 %vm110_vm0, %v43_v12  ;;  %v90_v12 = vld [vmem:[%s1697_s2 + $0x60] sm:$0xff] }
  0x79   :  { %913 = vmatprep.mubr.msk.f32.mxu0 %vm110_vm0, %v44_v14  ;;  %v1071_v15 = vpack.c.bf16 %v91_v13, %v90_v12 }
  0x7b   :  { %1072 = vmatpush3.bf16.msra.mxu1 %v1071_v15 }
  0x7c   :  { %914 = vmatmul.mubr.msk.f32.gmra.mrb[28].mxu0 %vm110_vm0, %v44_v14  ;;  %1074 = vmatprep.subr.bf16.mxu1 %v1073_v20 }
  0x7d   :  { %915 = vmatprep.mubr.msk.f32.mxu0 %vm110_vm0, %v45_v16 }
  0x7f   :  { %1076 = vmatpush3.bf16.msra.mxu1 %v1075_v24 }
  0x80   :  { %916 = vmatmul.mubr.msk.f32.gmra.mrb[30].mxu0 %vm110_vm0, %v45_v16 }
 0x117   :  { %v1455_v41 = vpop.f32.mrb[0].mxu0 }
 0x118   :  { %v1457_v42 = vpop.f32.mrb[1].mxu0 }
 0x119   :  { %v416_v43 = vmax.f32 %v1455_v41, %v1457_v42 }
 0x11b   :  { %417 = vmax.xlane.f32.xlu0 %v416_v43  ;;  %v1461_v44 = vpop.f32.mrb[2].mxu0 }
 0x11c   :  { %v1463_v45 = vpop.f32.mrb[3].mxu0 }
 0x11d   :  { %v419_v46 = vmax.f32 %v1461_v44, %v1463_v45 }
 0x11f   :  { %420 = vmax.xlane.f32.xlu0 %v419_v46  ;;  %v1467_v47 = vpop.f32.mrb[4].mxu0 }
 0x120   :  { %v1469_v48 = vpop.f32.mrb[5].mxu0 }
 0x121   :  { %v422_v49 = vmax.f32 %v1467_v47, %v1469_v48 }
 0x123   :  { %423 = vmax.xlane.f32.xlu1 %v422_v49  ;;  %v1473_v50 = vpop.f32.mrb[6].mxu0 }
 0x124   :  { %v1475_v51 = vpop.f32.mrb[7].mxu0 }
 0x125   :  { %v425_v52 = vmax.f32 %v1473_v50, %v1475_v51 }
 0x127   :  { %426 = vmax.xlane.f32.xlu1 %v425_v52  ;;  %v1479_v53 = vpop.f32.mrb[8].mxu0 }
 0x128   :  { %v1487_v56 = vpop.f32.mrb[9].mxu0 }
 0x129   :  { %v428_v60 = vmax.f32 %v1479_v53, %v1487_v56 }
 0x12b   :  { %429 = vmax.xlane.f32.xlu0 %v428_v60  ;;  %v1497_v62 = vpop.f32.mrb[10].mxu0 }
 0x12c   :  { %v1505_v1 = vpop.f32.mrb[11].mxu0 }
 0x12d   :  { %v431_v5 = vmax.f32 %v1497_v62, %v1505_v1 }
 0x12f   :  { %432 = vmax.xlane.f32.xlu1 %v431_v5  ;;  %v1515_v7 = vpop.f32.mrb[12].mxu0 }
 0x130   :  { %v1523_v10 = vpop.f32.mrb[13].mxu0 }
 0x131   :  { %v434_v14 = vmax.f32 %v1515_v7, %v1523_v10 }
 0x133   :  { %435 = vmax.xlane.f32.xlu0 %v434_v14  ;;  %v1533_v16 = vpop.f32.mrb[14].mxu0 }
 0x134   :  { %v1541_v19 = vpop.f32.mrb[15].mxu0 }
 0x135   :  { %v437_v23 = vmax.f32 %v1533_v16, %v1541_v19 }
 0x137   :  { %438 = vmax.xlane.f32.xlu1 %v437_v23  ;;  %v1551_v25 = vpop.f32.mrb[16].mxu0 }
 0x138   :  { %v1553_v26 = vpop.f32.mrb[17].mxu0 }
 0x139   :  { %v440_v27 = vmax.f32 %v1551_v25, %v1553_v26 }
 0x13b   :  { %441 = vmax.xlane.f32.xlu0 %v440_v27  ;;  %v1557_v28 = vpop.f32.mrb[18].mxu0 }
 0x13c   :  { %v1559_v29 = vpop.f32.mrb[19].mxu0 }
 0x13d   :  { %v443_v30 = vmax.f32 %v1557_v28, %v1559_v29 }
 0x13f   :  { %444 = vmax.xlane.f32.xlu1 %v443_v30  ;;  %v1563_v31 = vpop.f32.mrb[20].mxu0 }
 0x140   :  { %v1565_v32 = vpop.f32.mrb[21].mxu0 }
 0x141   :  { %v446_v33 = vmax.f32 %v1563_v31, %v1565_v32 }
 0x143   :  { %447 = vmax.xlane.f32.xlu0 %v446_v33  ;;  %v1569_v34 = vpop.f32.mrb[22].mxu0 }
 0x144   :  { %v1571_v35 = vpop.f32.mrb[23].mxu0 }
 0x145   :  { %v449_v36 = vmax.f32 %v1569_v34, %v1571_v35 }
 0x147   :  { %450 = vmax.xlane.f32.xlu1 %v449_v36  ;;  %v1575_v37 = vpop.f32.mrb[24].mxu0 }
 0x148   :  { %v1577_v38 = vpop.f32.mrb[25].mxu0 }
 0x149   :  { %v452_v39 = vmax.f32 %v1575_v37, %v1577_v38 }
 0x14b   :  { %453 = vmax.xlane.f32.xlu0 %v452_v39  ;;  %v1581_v40 = vpop.f32.mrb[26].mxu0 }
 0x14c   :  { %v1583_v43 = vpop.f32.mrb[27].mxu0 }
 0x14d   :  { %v455_v46 = vmax.f32 %v1581_v40, %v1583_v43 }
 0x14f   :  { %456 = vmax.xlane.f32.xlu1 %v455_v46  ;;  %v1587_v49 = vpop.f32.mrb[28].mxu0 }
 0x150   :  { %v1589_v52 = vpop.f32.mrb[29].mxu0 }
 0x151   :  { %v458_v54 = vmax.f32 %v1587_v49, %v1589_v52 }
 0x153   :  { %459 = vmax.xlane.f32.xlu0 %v458_v54  ;;  %v1593_v55 = vpop.f32.mrb[30].mxu0 }
 0x154   :  { %v1595_v57 = vpop.f32.mrb[31].mxu0 }
 0x155   :  { %v461_v58 = vmax.f32 %v1593_v55, %v1595_v57 }
 0x157   :  { %462 = vmax.xlane.f32.xlu1 %v461_v58 }
 0x1a8   :  { %v418_v59 = vpop.xlane.xlu0 %417 }
 0x1a9   :  { %v464_v60 = vsub.f32 %v1455_v41, %v418_v59  ;;  %v465_v61 = vsub.f32 %v1457_v42, %v418_v59 }
 0x1ab   :  { %v496_v63 = vmul.f32 1.442695, %v464_v60  ;;  %v498_v0 = vmul.f32 1.442695, %v465_v61 }
 0x1ac   :  { %v421_v2 = vpop.xlane.xlu0 %420 }
 0x1ad   :  { %1077 = vpow2.f32 %v496_v63  ;;  %v466_v3 = vsub.f32 %v1461_v44, %v421_v2  ;;  %v467_v4 = vsub.f32 %v1463_v45, %v421_v2 }
 0x1ae   :  { %1079 = vpow2.f32 %v498_v0 }
 0x1af   :  { %v500_v5 = vmul.f32 1.442695, %v466_v3  ;;  %v502_v6 = vmul.f32 1.442695, %v467_v4 }
 0x1b0   :  { %v424_v8 = vpop.xlane.xlu1 %423 }
 0x1b1   :  { %1081 = vpow2.f32 %v500_v5  ;;  %v468_v9 = vsub.f32 %v1467_v47, %v424_v8  ;;  %v469_v11 = vsub.f32 %v1469_v48, %v424_v8 }
 0x1b2   :  { %1083 = vpow2.f32 %v502_v6 }
 0x1b3   :  { %v504_v41 = vmul.f32 1.442695, %v468_v9  ;;  %v506_v42 = vmul.f32 1.442695, %v469_v11 }
 0x1b4   :  { %v427_v12 = vpop.xlane.xlu1 %426 }
 0x1b5   :  { %1085 = vpow2.f32 %v504_v41  ;;  %v470_v13 = vsub.f32 %v1473_v50, %v427_v12  ;;  %v471_v44 = vsub.f32 %v1475_v51, %v427_v12 }
 0x1b6   :  { %1087 = vpow2.f32 %v506_v42 }
 0x1b7   :  { %v1078_v45 = vpop.eup %1077  ;;  %v508_v14 = vmul.f32 1.442695, %v470_v13  ;;  %v510_v15 = vmul.f32 1.442695, %v471_v44 }
 0x1b8   :  { %v1080_v17 = vpop.eup %1079  ;;  %v430_v18 = vpop.xlane.xlu0 %429 }
 0x1b9   :  { %1089 = vpow2.f32 %v508_v14  ;;  %672 = vmatprep.mubr.f32.mxu1 %v1080_v17  ;;  %v472_v47 = vsub.f32 %v1479_v53, %v430_v18  ;;  %v473_v48 = vsub.f32 %v1487_v56, %v430_v18  ;;  %v560_v20 = vadd.f32 %v1080_v17, %v1078_v45 }
 0x1ba   :  { %1091 = vpow2.f32 %v510_v15  ;;  %673 = vmatmul.mubr.f32.vlgmr.msra.gmra.mrb[0].mxu1 %v1078_v45 }
 0x1bb   :  { %v1082_v21 = vpop.eup %1081  ;;  %v512_v22 = vmul.f32 1.442695, %v472_v47  ;;  %v514_v50 = vmul.f32 1.442695, %v473_v48  ;;  %561 = vadd.xlane.f32.xlu0 %v560_v20 }
 0x1bc   :  { %v1084_v51 = vpop.eup %1083  ;;  %v433_v23 = vpop.xlane.xlu1 %432 }
 0x1bd   :  { %1093 = vpow2.f32 %v512_v22  ;;  %677 = vmatprep.mubr.f32.mxu1 %v1084_v51  ;;  %v474_v24 = vsub.f32 %v1497_v62, %v433_v23  ;;  %v475_v27 = vsub.f32 %v1505_v1, %v433_v23  ;;  %v563_v30 = vadd.f32 %v1084_v51, %v1082_v21 }
 0x1be   :  { %1095 = vpow2.f32 %v514_v50  ;;  %678 = vmatmul.mubr.f32.gmra.mrb[2].mxu1 %v1082_v21 }
 0x1bf   :  { %v1086_v53 = vpop.eup %1085  ;;  %v516_v56 = vmul.f32 1.442695, %v474_v24  ;;  %v518_v33 = vmul.f32 1.442695, %v475_v27  ;;  %564 = vadd.xlane.f32.xlu1 %v563_v30 }
 0x1c0   :  { %v1088_v36 = vpop.eup %1087  ;;  %v436_v39 = vpop.xlane.xlu0 %435 }
 0x1c1   :  { %1097 = vpow2.f32 %v516_v56  ;;  %682 = vmatprep.mubr.f32.mxu1 %v1088_v36  ;;  %v476_v46 = vsub.f32 %v1515_v7, %v436_v39  ;;  %v477_v54 = vsub.f32 %v1523_v10, %v436_v39  ;;  %v566_v58 = vadd.f32 %v1088_v36, %v1086_v53 }
 0x1c2   :  { %1099 = vpow2.f32 %v518_v33  ;;  %683 = vmatmul.mubr.f32.gmra.mrb[4].mxu1 %v1086_v53 }
 0x1c3   :  { %v1090_v62 = vpop.eup %1089  ;;  %v520_v1 = vmul.f32 1.442695, %v476_v46  ;;  %v522_v59 = vmul.f32 1.442695, %v477_v54  ;;  %567 = vadd.xlane.f32.xlu0 %v566_v58 }
 0x1c4   :  { %v1092_v60 = vpop.eup %1091  ;;  %v439_v61 = vpop.xlane.xlu1 %438 }
 0x1c5   :  { %1101 = vpow2.f32 %v520_v1  ;;  %687 = vmatprep.mubr.f32.mxu1 %v1092_v60  ;;  %v478_v63 = vsub.f32 %v1533_v16, %v439_v61  ;;  %v479_v0 = vsub.f32 %v1541_v19, %v439_v61  ;;  %v569_v2 = vadd.f32 %v1092_v60, %v1090_v62 }
 0x1c6   :  { %1103 = vpow2.f32 %v522_v59  ;;  %688 = vmatmul.mubr.f32.gmra.mrb[6].mxu1 %v1090_v62 }
 0x1c7   :  { %v1094_v7 = vpop.eup %1093  ;;  %v524_v10 = vmul.f32 1.442695, %v478_v63  ;;  %v526_v3 = vmul.f32 1.442695, %v479_v0  ;;  %570 = vadd.xlane.f32.xlu1 %v569_v2 }
 0x1c8   :  { %v1096_v4 = vpop.eup %1095  ;;  %v442_v5 = vpop.xlane.xlu0 %441 }
 0x1c9   :  { %1105 = vpow2.f32 %v524_v10  ;;  %692 = vmatprep.mubr.f32.mxu1 %v1096_v4  ;;  %v480_v6 = vsub.f32 %v1551_v25, %v442_v5  ;;  %v481_v8 = vsub.f32 %v1553_v26, %v442_v5  ;;  %v572_v9 = vadd.f32 %v1096_v4, %v1094_v7 }
 0x1ca   :  { %1107 = vpow2.f32 %v526_v3  ;;  %693 = vmatmul.mubr.f32.gmra.mrb[8].mxu1 %v1094_v7 }
 0x1cb   :  { %v1098_v16 = vpop.eup %1097  ;;  %v528_v19 = vmul.f32 1.442695, %v480_v6  ;;  %v530_v11 = vmul.f32 1.442695, %v481_v8  ;;  %573 = vadd.xlane.f32.xlu0 %v572_v9 }
 0x1cc   :  { %v1100_v41 = vpop.eup %1099  ;;  %v445_v42 = vpop.xlane.xlu1 %444 }
 0x1cd   :  { %1109 = vpow2.f32 %v528_v19  ;;  %697 = vmatprep.mubr.f32.mxu1 %v1100_v41  ;;  %v482_v12 = vsub.f32 %v1557_v28, %v445_v42  ;;  %v483_v13 = vsub.f32 %v1559_v29, %v445_v42  ;;  %v575_v44 = vadd.f32 %v1100_v41, %v1098_v16 }
 0x1ce   :  { %1111 = vpow2.f32 %v530_v11  ;;  %698 = vmatmul.mubr.f32.gmra.mrb[10].mxu1 %v1098_v16 }
 0x1cf   :  { %v1102_v25 = vpop.eup %1101  ;;  %v532_v26 = vmul.f32 1.442695, %v482_v12  ;;  %v534_v45 = vmul.f32 1.442695, %v483_v13  ;;  %576 = vadd.xlane.f32.xlu1 %v575_v44 }
 0x1d0   :  { %v1104_v14 = vpop.eup %1103  ;;  %v448_v15 = vpop.xlane.xlu0 %447 }
 0x1d1   :  { %1113 = vpow2.f32 %v532_v26  ;;  %702 = vmatprep.mubr.f32.mxu1 %v1104_v14  ;;  %v484_v17 = vsub.f32 %v1563_v31, %v448_v15  ;;  %v485_v18 = vsub.f32 %v1565_v32, %v448_v15  ;;  %v578_v47 = vadd.f32 %v1104_v14, %v1102_v25 }
 0x1d2   :  { %1115 = vpow2.f32 %v534_v45  ;;  %703 = vmatmul.mubr.f32.gmra.mrb[12].mxu1 %v1102_v25 }
 0x1d3   :  { %v1106_v28 = vpop.eup %1105  ;;  %v536_v29 = vmul.f32 1.442695, %v484_v17  ;;  %v538_v48 = vmul.f32 1.442695, %v485_v18  ;;  %579 = vadd.xlane.f32.xlu0 %v578_v47 }
 0x1d4   :  { %v1108_v20 = vpop.eup %1107  ;;  %v451_v21 = vpop.xlane.xlu1 %450 }
 0x1d5   :  { %1117 = vpow2.f32 %v536_v29  ;;  %707 = vmatprep.mubr.f32.mxu1 %v1108_v20  ;;  %v486_v22 = vsub.f32 %v1569_v34, %v451_v21  ;;  %v487_v50 = vsub.f32 %v1571_v35, %v451_v21  ;;  %v581_v51 = vadd.f32 %v1108_v20, %v1106_v28 }
 0x1d6   :  { %1119 = vpow2.f32 %v538_v48  ;;  %708 = vmatmul.mubr.f32.gmra.mrb[14].mxu1 %v1106_v28 }
 0x1d7   :  { %v1110_v31 = vpop.eup %1109  ;;  %v540_v32 = vmul.f32 1.442695, %v486_v22  ;;  %v542_v23 = vmul.f32 1.442695, %v487_v50  ;;  %582 = vadd.xlane.f32.xlu1 %v581_v51 }
 0x1d8   :  { %v1112_v24 = vpop.eup %1111  ;;  %v454_v27 = vpop.xlane.xlu0 %453 }
 0x1d9   :  { %1121 = vpow2.f32 %v540_v32  ;;  %712 = vmatprep.mubr.f32.mxu1 %v1112_v24  ;;  %v488_v30 = vsub.f32 %v1575_v37, %v454_v27  ;;  %v489_v53 = vsub.f32 %v1577_v38, %v454_v27  ;;  %v584_v56 = vadd.f32 %v1112_v24, %v1110_v31 }
 0x1da   :  { %1123 = vpow2.f32 %v542_v23  ;;  %713 = vmatmul.mubr.f32.gmra.mrb[16].mxu1 %v1110_v31 }
 0x1db   :  { %v1114_v34 = vpop.eup %1113  ;;  %v544_v35 = vmul.f32 1.442695, %v488_v30  ;;  %v546_v33 = vmul.f32 1.442695, %v489_v53  ;;  %585 = vadd.xlane.f32.xlu0 %v584_v56 }
 0x1dc   :  { %v1116_v36 = vpop.eup %1115  ;;  %v457_v39 = vpop.xlane.xlu1 %456 }
 0x1dd   :  { %1125 = vpow2.f32 %v544_v35  ;;  %717 = vmatprep.mubr.f32.mxu1 %v1116_v36  ;;  %v490_v46 = vsub.f32 %v1581_v40, %v457_v39  ;;  %v491_v54 = vsub.f32 %v1583_v43, %v457_v39  ;;  %v587_v58 = vadd.f32 %v1116_v36, %v1114_v34 }
 0x1de   :  { %1127 = vpow2.f32 %v546_v33  ;;  %718 = vmatmul.mubr.f32.gmra.mrb[18].mxu1 %v1114_v34 }
 0x1df   :  { %v1118_v37 = vpop.eup %1117  ;;  %v548_v38 = vmul.f32 1.442695, %v490_v46  ;;  %v550_v62 = vmul.f32 1.442695, %v491_v54  ;;  %588 = vadd.xlane.f32.xlu1 %v587_v58 }
 0x1e0   :  { %v1120_v1 = vpop.eup %1119  ;;  %v460_v59 = vpop.xlane.xlu0 %459 }
 0x1e1   :  { %1129 = vpow2.f32 %v548_v38  ;;  %722 = vmatprep.mubr.f32.mxu1 %v1120_v1  ;;  %v492_v60 = vsub.f32 %v1587_v49, %v460_v59  ;;  %v493_v61 = vsub.f32 %v1589_v52, %v460_v59  ;;  %v590_v63 = vadd.f32 %v1120_v1, %v1118_v37 }
 0x1e2   :  { %1131 = vpow2.f32 %v550_v62  ;;  %723 = vmatmul.mubr.f32.gmra.mrb[20].mxu1 %v1118_v37 }
 0x1e3   :  { %v1122_v40 = vpop.eup %1121  ;;  %v552_v43 = vmul.f32 1.442695, %v492_v60  ;;  %v554_v0 = vmul.f32 1.442695, %v493_v61  ;;  %591 = vadd.xlane.f32.xlu0 %v590_v63 }
 0x1e4   :  { %v1124_v2 = vpop.eup %1123  ;;  %v463_v7 = vpop.xlane.xlu1 %462 }
 0x1e5   :  { %1133 = vpow2.f32 %v552_v43  ;;  %727 = vmatprep.mubr.f32.mxu1 %v1124_v2  ;;  %v494_v10 = vsub.f32 %v1593_v55, %v463_v7  ;;  %v495_v3 = vsub.f32 %v1595_v57, %v463_v7  ;;  %v593_v4 = vadd.f32 %v1124_v2, %v1122_v40 }
 0x1e6   :  { %1135 = vpow2.f32 %v554_v0  ;;  %728 = vmatmul.mubr.f32.gmra.mrb[22].mxu1 %v1122_v40 }
 0x1e7   :  { %v1126_v49 = vpop.eup %1125  ;;  %v556_v52 = vmul.f32 1.442695, %v494_v10  ;;  %v558_v5 = vmul.f32 1.442695, %v495_v3  ;;  %594 = vadd.xlane.f32.xlu1 %v593_v4 }
 0x1e8   :  { %v1128_v6 = vpop.eup %1127 }
 0x1e9   :  { %1137 = vpow2.f32 %v556_v52  ;;  %732 = vmatprep.mubr.f32.mxu1 %v1128_v6  ;;  %v596_v8 = vadd.f32 %v1128_v6, %v1126_v49 }
 0x1ea   :  { %1139 = vpow2.f32 %v558_v5  ;;  %733 = vmatmul.mubr.f32.gmra.mrb[24].mxu1 %v1126_v49 }
 0x1eb   :  { %v1130_v9 = vpop.eup %1129  ;;  %597 = vadd.xlane.f32.xlu0 %v596_v8 }
 0x1ec   :  { %v1132_v16 = vpop.eup %1131 }
 0x1ed   :  { %737 = vmatprep.mubr.f32.mxu1 %v1132_v16  ;;  %v599_v55 = vadd.f32 %v1132_v16, %v1130_v9 }
 0x1ee   :  { %738 = vmatmul.mubr.f32.gmra.mrb[26].mxu1 %v1130_v9 }
 0x1ef   :  { %v1134_v57 = vpop.eup %1133  ;;  %600 = vadd.xlane.f32.xlu1 %v599_v55 }
 0x1f0   :  { %v1136_v19 = vpop.eup %1135 }
 0x1f1   :  { %742 = vmatprep.mubr.f32.mxu1 %v1136_v19  ;;  %v602_v11 = vadd.f32 %v1136_v19, %v1134_v57 }
 0x1f2   :  { %743 = vmatmul.mubr.f32.gmra.mrb[28].mxu1 %v1134_v57 }
 0x1f3   :  { %v1138_v41 = vpop.eup %1137  ;;  %603 = vadd.xlane.f32.xlu0 %v602_v11 }
 0x1f4   :  { %v1140_v42 = vpop.eup %1139 }
 0x1f5   :  { %747 = vmatprep.mubr.f32.mxu1 %v1140_v42  ;;  %v605_v12 = vadd.f32 %v1140_v42, %v1138_v41 }
 0x1f6   :  { %748 = vmatmul.mubr.f32.gmra.mrb[30].mxu1 %v1138_v41 }
 0x1f7   :  { %606 = vadd.xlane.f32.xlu1 %v605_v12 }
 0x248   :  { %v562_v13 = vpop.xlane.xlu0 %561 }
 0x249   :  { %1141 = vrcp.f32 %v562_v13 }
 0x24c   :  { %v565_v44 = vpop.xlane.xlu1 %564 }
 0x24d   :  { %1143 = vrcp.f32 %v565_v44 }
 0x250   :  { %v568_v25 = vpop.xlane.xlu0 %567 }
 0x251   :  { %1145 = vrcp.f32 %v568_v25 }
 0x253   :  { %v1142_v17 = vpop.eup %1141 }
 0x254   :  { %v571_v14 = vpop.xlane.xlu1 %570 }
 0x255   :  { %1147 = vrcp.f32 %v571_v14 }
 0x257   :  { %v1144_v20 = vpop.eup %1143 }
 0x258   :  { %v574_v29 = vpop.xlane.xlu0 %573 }
 0x259   :  { %1149 = vrcp.f32 %v574_v29 }
 0x25b   :  { %v1146_v32 = vpop.eup %1145 }
 0x25c   :  { %v577_v51 = vpop.xlane.xlu1 %576 }
 0x25d   :  { %1151 = vrcp.f32 %v577_v51 }
 0x25f   :  { %v1148_v56 = vpop.eup %1147 }
 0x260   :  { %v580_v30 = vpop.xlane.xlu0 %579 }
 0x261   :  { %1153 = vrcp.f32 %v580_v30 }
 0x263   :  { %v1150_v46 = vpop.eup %1149 }
 0x264   :  { %v583_v36 = vpop.xlane.xlu1 %582 }
 0x265   :  { %1155 = vrcp.f32 %v583_v36 }
 0x267   :  { %v1152_v1 = vpop.eup %1151 }
 0x268   :  { %v586_v38 = vpop.xlane.xlu0 %585 }
 0x269   :  { %1157 = vrcp.f32 %v586_v38 }
 0x26b   :  { %v1154_v43 = vpop.eup %1153 }
 0x26c   :  { %v589_v63 = vpop.xlane.xlu1 %588 }
 0x26d   :  { %1159 = vrcp.f32 %v589_v63 }
 0x26f   :  { %v1156_v4 = vpop.eup %1155 }
 0x270   :  { %v592_v10 = vpop.xlane.xlu0 %591 }
 0x271   :  { %1161 = vrcp.f32 %v592_v10 }
 0x273   :  { %v1158_v9 = vpop.eup %1157 }
 0x274   :  { %v595_v6 = vpop.xlane.xlu1 %594 }
 0x275   :  { %1163 = vrcp.f32 %v595_v6 }
 0x277   :  { %v1160_v41 = vpop.eup %1159 }
 0x278   :  { %v598_v19 = vpop.xlane.xlu0 %597 }
 0x279   :  { %1165 = vrcp.f32 %v598_v19 }
 0x27c   :  { %v601_v44 = vpop.xlane.xlu1 %600 }
 0x27d   :  { %1167 = vrcp.f32 %v601_v44 }
 0x28d   :  { %v949_v26 = vpop.f32.mrb[0].mxu1 }
 0x28e   :  { %v950_v45 = vpop.f32.mrb[1].mxu1 }
 0x28f   :  { %v951_v15 = vadd.f32 %v950_v45, %v949_v26  ;;  %v1162_v26 = vpop.eup %1161 }
 0x291   :  { %v769_v18 = vmul.f32 %v1142_v17, %v951_v15  ;;  %v952_v47 = vpop.f32.mrb[2].mxu1  ;;  %v604_v17 = vpop.xlane.xlu0 %603 }
 0x292   :  { %v953_v28 = vpop.f32.mrb[3].mxu1  ;;  %1169 = vrcp.f32 %v604_v17 }
 0x293   :  { %785 = vst.msk [vmem:[%s1698_s3] sm:$0xff] %vm110_vm0, %v769_v18  ;;  %v954_v48 = vadd.f32 %v953_v28, %v952_v47  ;;  %v1164_v47 = vpop.eup %1163 }
 0x295   :  { %v770_v21 = vmul.f32 %v1144_v20, %v954_v48  ;;  %v955_v22 = vpop.f32.mrb[4].mxu1  ;;  %v607_v20 = vpop.xlane.xlu1 %606 }
 0x296   :  { %v956_v50 = vpop.f32.mrb[5].mxu1  ;;  %1171 = vrcp.f32 %v607_v20 }
 0x297   :  { %786 = vst.msk [vmem:[%s1698_s3 + $0x8] sm:$0xff] %vm110_vm0, %v770_v21  ;;  %v957_v31 = vadd.f32 %v956_v50, %v955_v22  ;;  %v1166_v22 = vpop.eup %1165 }
 0x299   :  { %v771_v23 = vmul.f32 %v1146_v32, %v957_v31  ;;  %v958_v24 = vpop.f32.mrb[6].mxu1 }
 0x29a   :  { %v959_v27 = vpop.f32.mrb[7].mxu1 }
 0x29b   :  { %787 = vst.msk [vmem:[%s1698_s3 + $0x10] sm:$0xff] %vm110_vm0, %v771_v23  ;;  %v960_v53 = vadd.f32 %v959_v27, %v958_v24  ;;  %v1168_v23 = vpop.eup %1167 }
 0x29d   :  { %v772_v34 = vmul.f32 %v1148_v56, %v960_v53  ;;  %v961_v35 = vpop.f32.mrb[8].mxu1  ;;  %v1170_v56 = vpop.eup %1169 }
 0x29e   :  { %v962_v33 = vpop.f32.mrb[9].mxu1 }
 0x29f   :  { %788 = vst.msk [vmem:[%s1698_s3 + $0x18] sm:$0xff] %vm110_vm0, %v772_v34  ;;  %v963_v39 = vadd.f32 %v962_v33, %v961_v35 }
 0x2a1   :  { %v773_v54 = vmul.f32 %v1150_v46, %v963_v39  ;;  %v964_v58 = vpop.f32.mrb[10].mxu1  ;;  %v1172_v39 = vpop.eup %1171 }
 0x2a2   :  { %v965_v37 = vpop.f32.mrb[11].mxu1 }
 0x2a3   :  { %789 = vst.msk [vmem:[%s1698_s3 + $0x20] sm:$0xff] %vm110_vm0, %v773_v54  ;;  %v966_v62 = vadd.f32 %v965_v37, %v964_v58 }
 0x2a5   :  { %v774_v59 = vmul.f32 %v1152_v1, %v966_v62  ;;  %v967_v60 = vpop.f32.mrb[12].mxu1 }
 0x2a6   :  { %v968_v61 = vpop.f32.mrb[13].mxu1 }
 0x2a7   :  { %790 = vst.msk [vmem:[%s1698_s3 + $0x28] sm:$0xff] %vm110_vm0, %v774_v59  ;;  %v969_v40 = vadd.f32 %v968_v61, %v967_v60 }
 0x2a9   :  { %v775_v0 = vmul.f32 %v1154_v43, %v969_v40  ;;  %v970_v2 = vpop.f32.mrb[14].mxu1 }
 0x2aa   :  { %v971_v7 = vpop.f32.mrb[15].mxu1 }
 0x2ab   :  { %791 = vst.msk [vmem:[%s1698_s3 + $0x30] sm:$0xff] %vm110_vm0, %v775_v0  ;;  %v972_v3 = vadd.f32 %v971_v7, %v970_v2 }
 0x2ad   :  { %v776_v49 = vmul.f32 %v1156_v4, %v972_v3  ;;  %v973_v52 = vpop.f32.mrb[16].mxu1 }
 0x2ae   :  { %v974_v5 = vpop.f32.mrb[17].mxu1 }
 0x2af   :  { %792 = vst.msk [vmem:[%s1698_s3 + $0x38] sm:$0xff] %vm110_vm0, %v776_v49  ;;  %v975_v8 = vadd.f32 %v974_v5, %v973_v52 }
 0x2b1   :  { %v777_v16 = vmul.f32 %v1158_v9, %v975_v8  ;;  %v976_v55 = vpop.f32.mrb[18].mxu1 }
 0x2b2   :  { %v977_v57 = vpop.f32.mrb[19].mxu1 }
 0x2b3   :  { %793 = vst.msk [vmem:[%s1698_s3 + $0x40] sm:$0xff] %vm110_vm0, %v777_v16  ;;  %v978_v11 = vadd.f32 %v977_v57, %v976_v55 }
 0x2b5   :  { %v778_v42 = vmul.f32 %v1160_v41, %v978_v11  ;;  %v979_v12 = vpop.f32.mrb[20].mxu1 }
 0x2b6   :  { %v980_v13 = vpop.f32.mrb[21].mxu1 }
 0x2b7   :  { %794 = vst.msk [vmem:[%s1698_s3 + $0x48] sm:$0xff] %vm110_vm0, %v778_v42  ;;  %v981_v25 = vadd.f32 %v980_v13, %v979_v12 }
 0x2b9   :  { %v779_v45 = vmul.f32 %v1162_v26, %v981_v25  ;;  %v982_v14 = vpop.f32.mrb[22].mxu1 }
 0x2ba   :  { %v983_v15 = vpop.f32.mrb[23].mxu1 }
 0x2bb   :  { %795 = vst.msk [vmem:[%s1698_s3 + $0x50] sm:$0xff] %vm110_vm0, %v779_v45  ;;  %v984_v18 = vadd.f32 %v983_v15, %v982_v14 }
 0x2bd   :  { %v780_v28 = vmul.f32 %v1164_v47, %v984_v18  ;;  %v985_v29 = vpop.f32.mrb[24].mxu1 }
 0x2be   :  { %v986_v48 = vpop.f32.mrb[25].mxu1 }
 0x2bf   :  { %796 = vst.msk [vmem:[%s1698_s3 + $0x58] sm:$0xff] %vm110_vm0, %v780_v28  ;;  %v987_v21 = vadd.f32 %v986_v48, %v985_v29 }
 0x2c1   :  { %v781_v50 = vmul.f32 %v1166_v22, %v987_v21  ;;  %v988_v51 = vpop.f32.mrb[26].mxu1 }
 0x2c2   :  { %v989_v31 = vpop.f32.mrb[27].mxu1 }
 0x2c3   :  { %797 = vst.msk [vmem:[%s1698_s3 + $0x60] sm:$0xff] %vm110_vm0, %v781_v50  ;;  %v990_v32 = vadd.f32 %v989_v31, %v988_v51 }
 0x2c5   :  { %v782_v24 = vmul.f32 %v1168_v23, %v990_v32  ;;  %v991_v27 = vpop.f32.mrb[28].mxu1 }
 0x2c6   :  { %v992_v30 = vpop.f32.mrb[29].mxu1 }
 0x2c7   :  { %798 = vst.msk [vmem:[%s1698_s3 + $0x68] sm:$0xff] %vm110_vm0, %v782_v24  ;;  %v993_v53 = vadd.f32 %v992_v30, %v991_v27 }
 0x2c9   :  { %v783_v34 = vmul.f32 %v1170_v56, %v993_v53  ;;  %v994_v35 = vpop.f32.mrb[30].mxu1 }
 0x2ca   :  { %v995_v33 = vpop.f32.mrb[31].mxu1 }
 0x2cb   :  { %799 = vst.msk [vmem:[%s1698_s3 + $0x70] sm:$0xff] %vm110_vm0, %v783_v34  ;;  %v996_v36 = vadd.f32 %v995_v33, %v994_v35 }
 0x2cd   :  { %v784_v46 = vmul.f32 %v1172_v39, %v996_v36 }
 0x2cf   :  { %800 = vst.msk [vmem:[%s1698_s3 + $0x78] sm:$0xff] %vm110_vm0, %v784_v46 }

</bundles_post_ra>
